<compile_context>
chip_gen: v6e
topology: v6e:2x2x1
jax: 0.10.0
libtpu: 0.0.40
codegen_flags: <defaults>
</compile_context>

<pallas_src>
import functools

import numpy as np
import jax
import jax.numpy as jnp
from jax import lax
from jax.experimental import pallas as pl
from jax.experimental.pallas import tpu as pltpu

TOP_K = 5      # the PyTorch forward hard-codes k=5


def _round_up(a, b):
    return ((a + b - 1) // b) * b


def _split_bf16(m64):
    """float64 numpy matrix -> (hi, lo) bf16 pair with hi + lo ~= f32(m)."""
    m32 = jnp.asarray(m64, jnp.float32)
    hi = m32.astype(jnp.bfloat16)
    lo = (m32 - hi.astype(jnp.float32)).astype(jnp.bfloat16)
    return hi, lo


@functools.lru_cache(maxsize=None)
def _dft_matrices(T):
    """Tight-packed, lane-padded real-DFT matrices as bf16 (hi, lo) pairs."""
    F = T // 2 + 1
    P = _round_up(2 * F, 128)                        # packed real|imag width
    n = np.arange(T, dtype=np.float64)[:, None]
    k = np.arange(F, dtype=np.float64)[None, :]
    ang = 2.0 * np.pi * n * k / T                    # [T, F]

    # forward:  xrxi = x @ wf ;  xr = xrxi[:, :F], xi = xrxi[:, F:2F]
    wf = np.zeros((T, P), np.float64)
    wf[:, :F] = np.cos(ang)
    wf[:, F:2 * F] = -np.sin(ang)

    # inverse (Hermitian weights baked in, T even): season = masked_xrxi @ wi
    w = np.full((F, 1), 2.0)
    w[0, 0] = 1.0                                    # DC bin
    w[-1, 0] = 1.0                                   # Nyquist bin
    wi = np.zeros((P, T), np.float64)
    wi[:F, :] = w * np.cos(ang.T) / T
    wi[F:2 * F, :] = -w * np.sin(ang.T) / T

    wf_hi, wf_lo = _split_bf16(wf)
    wi_hi, wi_lo = _split_bf16(wi)
    return wf_hi, wf_lo, wi_hi, wi_lo, P


def _vmem_params():
    """(vmem_limit_bytes, row-tile budget) sized per TPU generation."""
    try:
        cap = int(pltpu.get_tpu_info().vmem_capacity_bytes)
    except Exception:
        cap = 0
    if cap <= 0:
        cap = 64 << 20          # conservative fallback: v7x per-TC VMEM
    limit = min((cap * 3) // 4, 100 << 20)   # ~48 MiB on v7x, ~96 MiB on v5e/v6e
    budget = (limit * 3) // 4
    return limit, budget


def _pick_row_tile(R, T, P, budget_bytes, max_tile=2048):
    """Row tile: VMEM-budgeted, multiple of 8 (or == R), preferring divisors of R."""
    per_row = 2 * (T * 4)          # x block (double-buffered)
    per_row += 2 * (2 * T * 4)     # fused season|trend block (double-buffered)
    per_row += 12 * (P * 4)        # spectrum slab + squared/rolled/masked temporaries
    mats = 2 * (4 * T * P * 2)     # four resident bf16 matrices (double-buffered)
    avail = max(budget_bytes - mats, per_row * 8)
    tile = min(max_tile, avail // per_row, R)
    # leave >=2 grid steps when R allows, so v7x's two TensorCores both get work
    tile = min(tile, max(8, _round_up(-(-R // 2), 8)))
    tile = max(8, (tile // 8) * 8)
    if tile >= R:
        return R                   # single full-R block: grid=(1,), no padding
    if R % 8 == 0:
        t = tile
        while t >= 8 and R % t:
            t -= 8
        if t >= 8:
            return t               # divides R: no host-side pad, no output row slice
    return tile                    # fall back: pad rows up to a multiple of tile


def _dft_kernel(x_ref, wf_hi_ref, wf_lo_ref, wi_hi_ref, wi_lo_ref, out_ref, *,
                n_freq, n_zero_rows, thr2):
    rt, T = x_ref.shape
    P = wf_hi_ref.shape[1]
    F = n_freq

    x = x_ref[...]                                       # f32 [rt, T]
    x_hi = x.astype(jnp.bfloat16)
    x_lo = (x - x_hi.astype(jnp.float32)).astype(jnp.bfloat16)

    # forward real DFT: 3 bf16 MXU dots (split precision), f32 accumulation
    xrxi = (jnp.dot(x_hi, wf_hi_ref[...], preferred_element_type=jnp.float32)
            + jnp.dot(x_hi, wf_lo_ref[...], preferred_element_type=jnp.float32)
            + jnp.dot(x_lo, wf_hi_ref[...], preferred_element_type=jnp.float32))

    # per-bin |xf|^2 in the packed layout: add the other half's square via two
    # XLU rolls; column guards keep the mask exact for any F / padding width.
    sq = xrxi * xrxi
    col = lax.broadcasted_iota(jnp.int32, (rt, P), 1)
    im_sq = jnp.where(col < F, pltpu.roll(sq, shift=P - F, axis=1), 0.0)
    re_sq = jnp.where((col >= F) & (col < 2 * F),
                      pltpu.roll(sq, shift=F, axis=1), 0.0)
    freq2 = sq + im_sq + re_sq

    # torch: freq[0] = 0  (zeroes the first n_zero_rows flattened rows)
    gid = pl.program_id(0) * rt + lax.broadcasted_iota(jnp.int32, (rt, P), 0)
    freq2 = jnp.where(gid < n_zero_rows, 0.0, freq2)

    # xf[freq <= thr] = 0 ; squared threshold thr2 is provably 0 for >=2-D inputs
    xf_m = jnp.where(freq2 > thr2, xrxi, 0.0)

    # inverse real DFT (Hermitian weights baked into wi), split precision again
    m_hi = xf_m.astype(jnp.bfloat16)
    m_lo = (xf_m - m_hi.astype(jnp.float32)).astype(jnp.bfloat16)
    season = (jnp.dot(m_hi, wi_hi_ref[...], preferred_element_type=jnp.float32)
              + jnp.dot(m_hi, wi_lo_ref[...], preferred_element_type=jnp.float32)
              + jnp.dot(m_lo, wi_hi_ref[...], preferred_element_type=jnp.float32))

    # lane-dense fused output block: [season | trend]
    out_ref[...] = jnp.concatenate([season, x - season], axis=-1).astype(out_ref.dtype)


def dft_decomp(x, top_k=TOP_K, row_tile=None):
    """Pallas equivalent of DFT.forward; returns (x_season, x_trend)."""
    assert x.ndim >= 2, "kernel implements the (batched) >=2-D semantics"
    T = x.shape[-1]
    assert T % 2 == 0, "torch.fft.irfft default output length assumes even last dim"
    F = T // 2 + 1
    assert F >= top_k
    R = int(np.prod(x.shape[:-1]))
    # torch: freq[0] = 0 zeroes the whole first slice along dim 0, i.e. the first
    # prod(x.shape[1:-1]) flattened rows; their top-k magnitudes are all 0, so the
    # GLOBAL threshold min(top-k values) is exactly 0 and is baked as a constant.
    n_zero_rows = int(np.prod(x.shape[1:-1]))

    wf_hi, wf_lo, wi_hi, wi_lo, P = _dft_matrices(T)
    vmem_limit, vmem_budget = _vmem_params()

    if row_tile is None:
        row_tile = _pick_row_tile(R, T, P, vmem_budget)
    row_tile = int(row_tile)
    if row_tile >= R:
        row_tile = R
    elif row_tile % 8:
        row_tile = _round_up(row_tile, 8)
    R_pad = _round_up(R, row_tile)
    grid = (R_pad // row_tile,)

    x2 = jnp.asarray(x, jnp.float32).reshape(R, T)
    if R_pad != R:
        x2 = jnp.pad(x2, ((0, R_pad - R), (0, 0)))

    fused = pl.pallas_call(
        functools.partial(_dft_kernel, n_freq=F, n_zero_rows=n_zero_rows, thr2=0.0),
        out_shape=jax.ShapeDtypeStruct((R_pad, 2 * T), jnp.float32),
        grid=grid,
        in_specs=[pl.BlockSpec((row_tile, T), lambda i: (i, 0)),
                  pl.BlockSpec((T, P), lambda i: (0, 0)),      # VMEM-resident matrices
                  pl.BlockSpec((T, P), lambda i: (0, 0)),
                  pl.BlockSpec((P, T), lambda i: (0, 0)),
                  pl.BlockSpec((P, T), lambda i: (0, 0))],
        out_specs=pl.BlockSpec((row_tile, 2 * T), lambda i: (i, 0)),
        compiler_params=pltpu.CompilerParams(
            dimension_semantics=("parallel",),    # shard row tiles across TCs (v7x)
            vmem_limit_bytes=vmem_limit),
    )(x2, wf_hi, wf_lo, wi_hi, wi_lo)

    if R_pad != R:
        fused = fused[:R]
    season = fused[:, :T].reshape(x.shape).astype(x.dtype)
    trend = fused[:, T:].reshape(x.shape).astype(x.dtype)
    return season, trend


def _reference(x, top_k=TOP_K):
    """Pure-JAX replica of the PyTorch forward (for verification)."""
    xf = jnp.fft.rfft(x, axis=-1)
    freq = jnp.abs(xf)
    freq = freq.at[0].set(0.0)
    top_vals, _ = lax.top_k(freq, top_k)
    thr = jnp.min(top_vals)
    xf = jnp.where(freq <= thr, jnp.zeros_like(xf), xf)
    season = jnp.fft.irfft(xf, n=x.shape[-1], axis=-1)
    trend = x - season
    return season, trend


if __name__ == "__main__":
    key = jax.random.PRNGKey(0)
    k1, k2 = jax.random.split(key)

    # shapes consistent with the module: FFT along the last (sequence) axis
    x_a = jax.random.normal(k1, (2, 4, 64), dtype=jnp.float32)   # [batch, channel, seq]
    season_a, trend_a = dft_decomp(x_a)
    jax.block_until_ready((season_a, trend_a))
    ref_sa, ref_ta = _reference(x_a)
    np.testing.assert_allclose(np.asarray(season_a), np.asarray(ref_sa), rtol=0, atol=2e-3)
    np.testing.assert_allclose(np.asarray(trend_a), np.asarray(ref_ta), rtol=0, atol=2e-3)

    # second case exercising a multi-step ("parallel") row grid
    x_b = jax.random.normal(k2, (3, 8, 64), dtype=jnp.float32)
    season_b, trend_b = dft_decomp(x_b, row_tile=8)              # grid = (3,)
    jax.block_until_ready((season_b, trend_b))
    ref_sb, ref_tb = _reference(x_b)
    np.testing.assert_allclose(np.asarray(season_b), np.asarray(ref_sb), rtol=0, atol=2e-3)
    np.testing.assert_allclose(np.asarray(trend_b), np.asarray(ref_tb), rtol=0, atol=2e-3)

    print("KERNEL_OK")
</pallas_src>

<mosaic_0001>
module attributes {stable_mosaic.version = 11 : i64} {
  func.func @_dft_kernel(%arg0: i32, %arg1: memref<8x64xf32, #tpu.memory_space<vmem>>, %arg2: memref<64x128xbf16, #tpu.memory_space<vmem>>, %arg3: memref<64x128xbf16, #tpu.memory_space<vmem>>, %arg4: memref<128x64xbf16, #tpu.memory_space<vmem>>, %arg5: memref<128x64xbf16, #tpu.memory_space<vmem>>, %arg6: memref<8x128xf32, #tpu.memory_space<vmem>>) attributes {dimension_semantics = [#tpu.dimension_semantics<parallel>], iteration_bounds = array<i64: 1>, scalar_prefetch = 0 : i64, scratch_operands = 0 : i64, tpu.core_type = #tpu.core_type<tc>, window_params = [{transform_indices = @transform_0, window_bounds = array<i64: 8, 64>}, {pipeline_mode = #tpu.pipeline_mode<synchronous>, transform_indices = @transform_1, window_bounds = array<i64: 64, 128>}, {pipeline_mode = #tpu.pipeline_mode<synchronous>, transform_indices = @transform_2, window_bounds = array<i64: 64, 128>}, {pipeline_mode = #tpu.pipeline_mode<synchronous>, transform_indices = @transform_3, window_bounds = array<i64: 128, 64>}, {pipeline_mode = #tpu.pipeline_mode<synchronous>, transform_indices = @transform_4, window_bounds = array<i64: 128, 64>}, {transform_indices = @transform_5, window_bounds = array<i64: 8, 128>}]} {
    %c0 = arith.constant 0 : index
    %c0_0 = arith.constant 0 : index
    %0 = vector.load %arg1[%c0, %c0_0] : memref<8x64xf32, #tpu.memory_space<vmem>>, vector<8x64xf32>
    %1 = arith.truncf %0 : vector<8x64xf32> to vector<8x64xbf16>
    %2 = arith.extf %1 : vector<8x64xbf16> to vector<8x64xf32>
    %3 = arith.subf %0, %2 : vector<8x64xf32>
    %4 = arith.truncf %3 : vector<8x64xf32> to vector<8x64xbf16>
    %c0_1 = arith.constant 0 : index
    %c0_2 = arith.constant 0 : index
    %5 = vector.load %arg2[%c0_1, %c0_2] : memref<64x128xbf16, #tpu.memory_space<vmem>>, vector<64x128xbf16>
    %cst = arith.constant dense<0.000000e+00> : vector<8x128xf32>
    %6 = tpu.matmul %1, %5, %cst {dimension_numbers = #tpu.dot_dimension_numbers<[1], [0], [0], [1], [0, 0, 1, 1], [], []>} : vector<8x64xbf16>, vector<64x128xbf16>, vector<8x128xf32> -> vector<8x128xf32>
    %c0_3 = arith.constant 0 : index
    %c0_4 = arith.constant 0 : index
    %7 = vector.load %arg3[%c0_3, %c0_4] : memref<64x128xbf16, #tpu.memory_space<vmem>>, vector<64x128xbf16>
    %cst_5 = arith.constant dense<0.000000e+00> : vector<8x128xf32>
    %8 = tpu.matmul %1, %7, %cst_5 {dimension_numbers = #tpu.dot_dimension_numbers<[1], [0], [0], [1], [0, 0, 1, 1], [], []>} : vector<8x64xbf16>, vector<64x128xbf16>, vector<8x128xf32> -> vector<8x128xf32>
    %9 = arith.addf %6, %8 : vector<8x128xf32>
    %c0_6 = arith.constant 0 : index
    %c0_7 = arith.constant 0 : index
    %10 = vector.load %arg2[%c0_6, %c0_7] : memref<64x128xbf16, #tpu.memory_space<vmem>>, vector<64x128xbf16>
    %cst_8 = arith.constant dense<0.000000e+00> : vector<8x128xf32>
    %11 = tpu.matmul %4, %10, %cst_8 {dimension_numbers = #tpu.dot_dimension_numbers<[1], [0], [0], [1], [0, 0, 1, 1], [], []>} : vector<8x64xbf16>, vector<64x128xbf16>, vector<8x128xf32> -> vector<8x128xf32>
    %12 = arith.addf %9, %11 : vector<8x128xf32>
    %13 = arith.mulf %12, %12 : vector<8x128xf32>
    %14 = tpu.iota {dimensions = array<i32: 1>} : vector<8x128xi32>
    %c33_i32 = arith.constant 33 : i32
    %15 = vector.broadcast %c33_i32 : i32 to vector<8x128xi32>
    %16 = arith.cmpi slt, %14, %15 : vector<8x128xi32>
    %c95_i32 = arith.constant 95 : i32
    %17 = tpu.dynamic_rotate %13 by %c95_i32 dim 1 : vector<8x128xf32>, i32 -> vector<8x128xf32>
    %cst_9 = arith.constant 0.000000e+00 : f32
    %18 = vector.broadcast %cst_9 : f32 to vector<8x128xf32>
    %19 = arith.select %16, %17, %18 : vector<8x128xi1>, vector<8x128xf32>
    %c33_i32_10 = arith.constant 33 : i32
    %20 = vector.broadcast %c33_i32_10 : i32 to vector<8x128xi32>
    %21 = arith.cmpi sge, %14, %20 : vector<8x128xi32>
    %c66_i32 = arith.constant 66 : i32
    %22 = vector.broadcast %c66_i32 : i32 to vector<8x128xi32>
    %23 = arith.cmpi slt, %14, %22 : vector<8x128xi32>
    %24 = arith.andi %21, %23 : vector<8x128xi1>
    %c33_i32_11 = arith.constant 33 : i32
    %25 = tpu.dynamic_rotate %13 by %c33_i32_11 dim 1 : vector<8x128xf32>, i32 -> vector<8x128xf32>
    %cst_12 = arith.constant 0.000000e+00 : f32
    %26 = vector.broadcast %cst_12 : f32 to vector<8x128xf32>
    %27 = arith.select %24, %25, %26 : vector<8x128xi1>, vector<8x128xf32>
    %28 = arith.addf %13, %19 : vector<8x128xf32>
    %29 = arith.addf %28, %27 : vector<8x128xf32>
    %c8_i32 = arith.constant 8 : i32
    %30 = arith.muli %arg0, %c8_i32 : i32
    %31 = tpu.iota {dimensions = array<i32: 0>} : vector<8x128xi32>
    %32 = vector.broadcast %30 : i32 to vector<8x128xi32>
    %33 = arith.addi %32, %31 : vector<8x128xi32>
    %c4_i32 = arith.constant 4 : i32
    %34 = vector.broadcast %c4_i32 : i32 to vector<8x128xi32>
    %35 = arith.cmpi slt, %33, %34 : vector<8x128xi32>
    %cst_13 = arith.constant 0.000000e+00 : f32
    %36 = vector.broadcast %cst_13 : f32 to vector<8x128xf32>
    %37 = arith.select %35, %36, %29 : vector<8x128xi1>, vector<8x128xf32>
    %cst_14 = arith.constant 0.000000e+00 : f32
    %38 = vector.broadcast %cst_14 : f32 to vector<8x128xf32>
    %39 = arith.cmpf ogt, %37, %38 : vector<8x128xf32>
    %cst_15 = arith.constant 0.000000e+00 : f32
    %40 = vector.broadcast %cst_15 : f32 to vector<8x128xf32>
    %41 = arith.select %39, %12, %40 : vector<8x128xi1>, vector<8x128xf32>
    %42 = arith.truncf %41 : vector<8x128xf32> to vector<8x128xbf16>
    %43 = arith.extf %42 : vector<8x128xbf16> to vector<8x128xf32>
    %44 = arith.subf %41, %43 : vector<8x128xf32>
    %45 = arith.truncf %44 : vector<8x128xf32> to vector<8x128xbf16>
    %c0_16 = arith.constant 0 : index
    %c0_17 = arith.constant 0 : index
    %46 = vector.load %arg4[%c0_16, %c0_17] : memref<128x64xbf16, #tpu.memory_space<vmem>>, vector<128x64xbf16>
    %cst_18 = arith.constant dense<0.000000e+00> : vector<8x64xf32>
    %47 = tpu.matmul %42, %46, %cst_18 {dimension_numbers = #tpu.dot_dimension_numbers<[1], [0], [0], [1], [0, 0, 1, 1], [], []>} : vector<8x128xbf16>, vector<128x64xbf16>, vector<8x64xf32> -> vector<8x64xf32>
    %c0_19 = arith.constant 0 : index
    %c0_20 = arith.constant 0 : index
    %48 = vector.load %arg5[%c0_19, %c0_20] : memref<128x64xbf16, #tpu.memory_space<vmem>>, vector<128x64xbf16>
    %cst_21 = arith.constant dense<0.000000e+00> : vector<8x64xf32>
    %49 = tpu.matmul %42, %48, %cst_21 {dimension_numbers = #tpu.dot_dimension_numbers<[1], [0], [0], [1], [0, 0, 1, 1], [], []>} : vector<8x128xbf16>, vector<128x64xbf16>, vector<8x64xf32> -> vector<8x64xf32>
    %50 = arith.addf %47, %49 : vector<8x64xf32>
    %c0_22 = arith.constant 0 : index
    %c0_23 = arith.constant 0 : index
    %51 = vector.load %arg4[%c0_22, %c0_23] : memref<128x64xbf16, #tpu.memory_space<vmem>>, vector<128x64xbf16>
    %cst_24 = arith.constant dense<0.000000e+00> : vector<8x64xf32>
    %52 = tpu.matmul %45, %51, %cst_24 {dimension_numbers = #tpu.dot_dimension_numbers<[1], [0], [0], [1], [0, 0, 1, 1], [], []>} : vector<8x128xbf16>, vector<128x64xbf16>, vector<8x64xf32> -> vector<8x64xf32>
    %53 = arith.addf %50, %52 : vector<8x64xf32>
    %54 = arith.subf %0, %53 : vector<8x64xf32>
    %55 = tpu.concatenate %53, %54 in 1 : vector<8x64xf32>, vector<8x64xf32> -> vector<8x128xf32>
    %c0_25 = arith.constant 0 : index
    %c0_26 = arith.constant 0 : index
    %56 = vector.load %arg6[%c0_25, %c0_26] : memref<8x128xf32, #tpu.memory_space<vmem>>, vector<8x128xf32>
    tpu.vector_store %arg6[%c0_25, %c0_26], %55 {strides = array<i32>} : memref<8x128xf32, #tpu.memory_space<vmem>>, vector<8x128xf32>,
    return
  }
  func.func @transform_0(%arg0: i32) -> (i32, i32) {
    %c0_i32 = arith.constant 0 : i32
    %c0_i32_0 = arith.constant 0 : i32
    return %arg0, %c0_i32 : i32, i32
  }
  func.func @transform_1(%arg0: i32) -> (i32, i32) {
    %c0_i32 = arith.constant 0 : i32
    %c0_i32_0 = arith.constant 0 : i32
    %c0_i32_1 = arith.constant 0 : i32
    return %c0_i32, %c0_i32_0 : i32, i32
  }
  func.func @transform_2(%arg0: i32) -> (i32, i32) {
    %c0_i32 = arith.constant 0 : i32
    %c0_i32_0 = arith.constant 0 : i32
    %c0_i32_1 = arith.constant 0 : i32
    return %c0_i32, %c0_i32_0 : i32, i32
  }
  func.func @transform_3(%arg0: i32) -> (i32, i32) {
    %c0_i32 = arith.constant 0 : i32
    %c0_i32_0 = arith.constant 0 : i32
    %c0_i32_1 = arith.constant 0 : i32
    return %c0_i32, %c0_i32_0 : i32, i32
  }
  func.func @transform_4(%arg0: i32) -> (i32, i32) {
    %c0_i32 = arith.constant 0 : i32
    %c0_i32_0 = arith.constant 0 : i32
    %c0_i32_1 = arith.constant 0 : i32
    return %c0_i32, %c0_i32_0 : i32, i32
  }
  func.func @transform_5(%arg0: i32) -> (i32, i32) {
    %c0_i32 = arith.constant 0 : i32
    %c0_i32_0 = arith.constant 0 : i32
    return %arg0, %c0_i32 : i32, i32
  }
}

</mosaic_0001>

<bundles_post_ra>
// kernel: tpu_custom_call.1
= control target key start
LH: loop header
LB: loop body
LE: loop exit
PB: predicated region body
PF: predicated region fallthrough
CT: control target
= control target key end

     0   :  { %v740_v1 = vmov 0.0   ;;  %vm741_vm0 = vmmov 0   ;;  %vm67_vm1 = vcmask 523264   ;;  %s936_s0 = inlined_call_operand.vmem [shape: f32[8,64], index: 0, kind: input, shape index: {}]   ;;  %s937_s1 = inlined_call_operand.vmem [shape: bf16[64,128], index: 1, kind: input, shape index: {}]   ;;  %s938_s2 = inlined_call_operand.vmem [shape: bf16[64,128], index: 2, kind: input, shape index: {}]   ;;  %s939_s3 = inlined_call_operand.vmem [shape: bf16[128,64], index: 3, kind: input, shape index: {}]   ;;  %s940_s4 = inlined_call_operand.vmem [shape: bf16[128,64], index: 4, kind: input, shape index: {}]   ;;  %s941_s5 = inlined_call_operand.hbm [shape: f32[8,128], index: 5, kind: output, shape index: {}]  }
   0x1   :  { %v694_v0 = vld [vmem:[%s938_s2 + $0x18] sm:$0xff]   ;;  %592 = vmatprep.subr.bf16.mxu0 %v740_v1  ;;  %604 = vmatprep.subr.bf16.mxu1 %v740_v1  ;;  %v696_v3 = vld [vmem:[%s938_s2 + $0x10] sm:$0xff]   ;;  %v698_v5 = vld [vmem:[%s938_s2 + $0x8] sm:$0xff]  }
   0x2   :  { %v695_v2 = vld [vmem:[%s937_s1 + $0x18] sm:$0xff]   ;;  %593 = vmatpush3.bf16.msra.mxu0 %v694_v0  ;;  %600 = vmatprep.mubr.msk.bf16.mxu0 %vm741_vm0, %v740_v1  ;;  %v697_v4 = vld [vmem:[%s937_s1 + $0x10] sm:$0xff]   ;;  %v699_v6 = vld [vmem:[%s937_s1 + $0x8] sm:$0xff]  }
   0x3   :  { %605 = vmatpush3.bf16.msra.mxu1 %v695_v2  ;;  %594 = vmatprep.subr.bf16.mxu0 %v740_v1  ;;  %v700_v7 = vld [vmem:[%s938_s2] sm:$0xff]  }
   0x4   :  { %606 = vmatprep.subr.bf16.mxu1 %v740_v1  ;;  %612 = vmatprep.mubr.msk.bf16.mxu1 %vm741_vm0, %v740_v1  ;;  %v810_v8 = vld [vmem:[%s936_s0] sm:$0xff] }
   0x5   :  { %v701_v9 = vld [vmem:[%s937_s1] sm:$0xff]   ;;  %v23_v10 = vpack.c.bf16 %v810_v8, %v810_v8 }
   0x6   :  { %595 = vmatpush3.bf16.msra.mxu0 %v696_v3 }
   0x7   :  { %607 = vmatpush3.bf16.msra.mxu1 %v697_v4  ;;  %596 = vmatprep.subr.bf16.mxu0 %v740_v1 }
   0x8   :  { %608 = vmatprep.subr.bf16.mxu1 %v740_v1 }
   0xa   :  { %597 = vmatpush3.bf16.msra.mxu0 %v698_v5 }
   0xb   :  { %609 = vmatpush3.bf16.msra.mxu1 %v699_v6  ;;  %598 = vmatprep.subr.bf16.mxu0 %v740_v1 }
   0xc   :  { %610 = vmatprep.subr.bf16.mxu1 %v740_v1 }
   0xe   :  { %599 = vmatpush3.bf16.msra.mxu0 %v700_v7 }
   0xf   :  { %611 = vmatpush3.bf16.msra.mxu1 %v701_v9  ;;  %616 = vmatprep.subr.bf16.mxu0 %v740_v1 }
  0x10   :  { %628 = vmatprep.subr.bf16.mxu1 %v740_v1 }
  0x11   :  { %601 = vmatmul.mubr.msk.bf16.vlgmr.msra.gmra.mxu0 %vm67_vm1, %v23_v10 }
  0x12   :  { %613 = vmatmul.mubr.msk.bf16.vlgmr.msra.gmra.mxu1 %vm67_vm1, %v23_v10  ;;  %617 = vmatpush3.bf16.msra.mxu0 %v695_v2 }
  0x13   :  { %618 = vmatprep.subr.bf16.mxu0 %v740_v1  ;;  %624 = vmatprep.mubr.msk.bf16.mxu0 %vm741_vm0, %v740_v1 }
  0x14   :  { %10 = vsyncpa [#allocation3], 0  ;;  %644 = vmatprep.mubr.msk.bf16.mxu1 %vm741_vm0, %v740_v1  ;;  %v24_v11 = vunpack.c.l.bf16 %v23_v10  ;;  %v702_v14 = vld [vmem:[%s940_s4 + $0x38] sm:$0xff]   ;;  %v704_v16 = vld [vmem:[%s940_s4 + $0x30] sm:$0xff]   ;;  %s742_s12 = smov 95   ;;  %v220_v45 = vlaneseq  ;;  %s745_s13 = smov [#allocation2]  }
  0x15   :  { %v841_v15 = vld [vmem:[%s939_s3 + $0x38] sm:$0xff]   ;;  %629 = vmatpush3.bf16.msra.mxu1 %v702_v14  ;;  %v850_v17 = vld [vmem:[%s939_s3 + $0x30] sm:$0xff]   ;;  %v706_v18 = vld [vmem:[%s940_s4 + $0x28] sm:$0xff]   ;;  %s509_s14 = sshll.u32 %s745_s13, 4  ;;  %s510_s14 = int_to_ptr.vmem [resolvable:$true] %s509_s14 }
  0x16   :  { %619 = vmatpush3.bf16.msra.mxu0 %v697_v4  ;;  %v25_v12 = vsub.f32 %v810_v8, %v24_v11  ;;  %630 = vmatprep.subr.bf16.mxu1 %v740_v1  ;;  %v861_v19 = vld [vmem:[%s939_s3 + $0x28] sm:$0xff]   ;;  %v708_v20 = vld [vmem:[%s940_s4 + $0x20] sm:$0xff]   ;;  %v710_v22 = vld [vmem:[%s940_s4 + $0x18] sm:$0xff]   ;;  %v221_v46 = vand.u32 127, %v220_v45  ;;  %v236_v49 = vshrl.u32 %v220_v45, 7  ;;  %s718_s15 = scalar_lea.vmem %s510_s14, 128  ;;  %p723_p1 = scmp.lt.s32.totalorder %s510_s14, %s510_s14 }
  0x17   :  { %620 = vmatprep.subr.bf16.mxu0 %v740_v1  ;;  %v872_v21 = vld [vmem:[%s939_s3 + $0x20] sm:$0xff]   ;;  %v883_v23 = vld [vmem:[%s939_s3 + $0x18] sm:$0xff]   ;;  %v712_v24 = vld [vmem:[%s940_s4 + $0x10] sm:$0xff]   ;;  %p719_p0 = scmp.ne.s32.totalorder %s510_s14, %s718_s15  ;;  %p724_p2 = scmp.lt.s32.totalorder %s718_s15, %s718_s15 }
  0x18   :  { %v26_v13 = vpack.c.bf16 %v25_v12, %v25_v12  ;;  %v894_v25 = vld [vmem:[%s939_s3 + $0x10] sm:$0xff]   ;;  %v714_v34 = vld [vmem:[%s940_s4 + $0x8] sm:$0xff]   ;;  %v716_v36 = vld [vmem:[%s940_s4] sm:$0xff]   ;;  %s743_s4 = smov 33   ;;  %vm222_vm2 = vcmp.lt.s32.totalorder %v221_v46, 33  ;;  %vm226_vm3 = vcmp.ge.s32.totalorder %v221_v46, 33 }
  0x19   :  { %631 = vmatpush3.bf16.msra.mxu1 %v704_v16  ;;  %v715_v35 = vld [vmem:[%s939_s3 + $0x8] sm:$0xff]   ;;  %v717_v37 = vld [vmem:[%s939_s3] sm:$0xff]   ;;  %vm227_vm4 = vcmp.lt.s32.totalorder %v221_v46, 66  ;;  %vm239_vm6 = vcmp.lt.s32.totalorder %v236_v49, 4  ;;  %s744_s3 = smov 64   ;;  %p725_p3 = por %p724_p2, %p723_p1 }
  0x1a   :  { %621 = vmatpush3.bf16.msra.mxu0 %v699_v6  ;;  %632 = vmatprep.subr.bf16.mxu1 %v740_v1  ;;  %vm228_vm5 = vmand %vm226_vm3, %vm227_vm4 }
  0x1b   :  { %622 = vmatprep.subr.bf16.mxu0 %v740_v1  ;;  %p726_p4 = pnand %p725_p3, %p719_p0 }
  0x1d   :  { %633 = vmatpush3.bf16.msra.mxu1 %v706_v18 }
  0x1e   :  { %623 = vmatpush3.bf16.msra.mxu0 %v701_v9  ;;  %634 = vmatprep.subr.bf16.mxu1 %v740_v1 }
  0x1f   :  { %648 = vmatprep.subr.bf16.mxu0 %v740_v1 }
  0x21   :  { %625 = vmatmul.mubr.msk.bf16.vlgmr.msra.gmra.mxu0 %vm67_vm1, %v26_v13  ;;  %635 = vmatpush3.bf16.msra.mxu1 %v708_v20 }
  0x22   :  { %664 = vmatprep.mubr.msk.bf16.mxu0 %vm741_vm0, %v740_v1  ;;  %649 = vmatpush3.bf16.msra.mxu0 %v841_v15 }
  0x23   :  { %650 = vmatprep.subr.bf16.mxu0 %v740_v1  ;;  %636 = vmatprep.subr.bf16.mxu1 %v740_v1 }
  0x25   :  { %637 = vmatpush3.bf16.msra.mxu1 %v710_v22 }
  0x26   :  { %651 = vmatpush3.bf16.msra.mxu0 %v850_v17  ;;  %638 = vmatprep.subr.bf16.mxu1 %v740_v1 }
  0x27   :  { %652 = vmatprep.subr.bf16.mxu0 %v740_v1 }
  0x29   :  { %639 = vmatpush3.bf16.msra.mxu1 %v712_v24 }
  0x2a   :  { %653 = vmatpush3.bf16.msra.mxu0 %v861_v19  ;;  %640 = vmatprep.subr.bf16.mxu1 %v740_v1 }
  0x2b   :  { %654 = vmatprep.subr.bf16.mxu0 %v740_v1 }
  0x2d   :  { %641 = vmatpush3.bf16.msra.mxu1 %v714_v34 }
  0x2e   :  { %655 = vmatpush3.bf16.msra.mxu0 %v872_v21  ;;  %642 = vmatprep.subr.bf16.mxu1 %v740_v1 }
  0x2f   :  { %656 = vmatprep.subr.bf16.mxu0 %v740_v1 }
  0x31   :  { %643 = vmatpush3.bf16.msra.mxu1 %v716_v36 }
  0x32   :  { %657 = vmatpush3.bf16.msra.mxu0 %v883_v23  ;;  %668 = vmatprep.subr.bf16.mxu1 %v740_v1 }
  0x33   :  { %658 = vmatprep.subr.bf16.mxu0 %v740_v1 }
  0x36   :  { %659 = vmatpush3.bf16.msra.mxu0 %v894_v25 }
  0x37   :  { %660 = vmatprep.subr.bf16.mxu0 %v740_v1 }
  0x3a   :  { %661 = vmatpush3.bf16.msra.mxu0 %v715_v35 }
  0x3b   :  { %662 = vmatprep.subr.bf16.mxu0 %v740_v1 }
  0x3e   :  { %663 = vmatpush3.bf16.msra.mxu0 %v717_v37 }
  0xd1   :  { %v105_v26 = vpop.f32.mrf.mxu0 }
  0xd2   :  { %v169_v27 = vpop.f32.mrf.mxu1 }
  0xd3   :  { %v602_v28 = vpop.f32.mrf.mxu0  ;;  %v170_v38 = vadd.f32 %v169_v27, %v105_v26 }
  0xd4   :  { %v614_v29 = vpop.f32.mrf.mxu1 }
  0xd5   :  { %v108_v30 = vpop.f32.mrf.mxu0 }
  0xd6   :  { %v172_v31 = vpop.f32.mrf.mxu1 }
  0xd7   :  { %v603_v32 = vpop.f32.mrf.mxu0 }
  0xd8   :  { %v615_v33 = vpop.f32.mrf.mxu1 }
  0xe1   :  { %v212_v39 = vpop.f32.mrf.mxu0 }
  0xe2   :  { %v218_v40 = vadd.f32 %v212_v39, %v170_v38 }
  0xe3   :  { %v626_v41 = vpop.f32.mrf.mxu0 }
  0xe4   :  { %v219_v42 = vmul.f32 %v218_v40, %v218_v40  ;;  %v537_v55 = vpack.c.bf16 %v218_v40, %v218_v40 }
  0xe5   :  { %v215_v43 = vpop.f32.mrf.mxu0 }
  0xe6   :  { %223 = vrot.lane.b32.xlu0 %v219_v42, %s742_s12 }
  0xe7   :  { %v627_v44 = vpop.f32.mrf.mxu0 }
  0xea   :  { %229 = vrot.lane.b32.xlu0 %v219_v42, %s743_s4 }
 0x158   :  { %v224_v47 = vpop.permute.xlu0 %223 }
 0x159   :  { %v225_v48 = vsel %vm222_vm2, %v224_v47, 0.0 }
 0x15a   :  { %v232_v50 = vadd.f32 %v225_v48, %v219_v42 }
 0x15c   :  { %v230_v51 = vpop.permute.xlu0 %229 }
 0x15d   :  { %v231_v52 = vsel %vm228_vm5, %v230_v51, 0.0 }
 0x15e   :  { %v233_v53 = vadd.f32 %v232_v50, %v231_v52 }
 0x160   :  { %v240_v54 = vsel %vm239_vm6, 0.0, %v233_v53 }
 0x161   :  { %vm241_vm7 = vcmp.gt.f32.partialorder %v240_v54, 0.0 }
 0x162   :  { %vm536_vm8 = vmpackc.low %vm241_vm7, %vm241_vm7  ;;  %v242_v56 = vsel %vm241_vm7, %v218_v40, 0.0 }
 0x163   :  { %645 = vmatmul.mubr.msk.bf16.vlgmr.msra.gmra.mxu1 %vm536_vm8, %v537_v55  ;;  %665 = vmatmul.mubr.msk.bf16.vlgmr.msra.gmra.mxu0 %vm536_vm8, %v537_v55  ;;  %v243_v57 = vpack.c.bf16 %v242_v56, %v242_v56 }
 0x164   :  { %669 = vmatpush3.bf16.msra.mxu1 %v841_v15  ;;  %684 = vmatprep.mubr.msk.bf16.mxu1 %vm741_vm0, %v740_v1 }
 0x165   :  { %670 = vmatprep.subr.bf16.mxu1 %v740_v1  ;;  %v244_v58 = vunpack.c.l.bf16 %v243_v57 }
 0x167   :  { %v245_v59 = vsub.f32 %v242_v56, %v244_v58 }
 0x168   :  { %671 = vmatpush3.bf16.msra.mxu1 %v850_v17 }
 0x169   :  { %672 = vmatprep.subr.bf16.mxu1 %v740_v1  ;;  %v246_v60 = vpack.c.bf16 %v245_v59, %v245_v59 }
 0x16c   :  { %673 = vmatpush3.bf16.msra.mxu1 %v861_v19 }
 0x16d   :  { %674 = vmatprep.subr.bf16.mxu1 %v740_v1 }
 0x170   :  { %675 = vmatpush3.bf16.msra.mxu1 %v872_v21 }
 0x171   :  { %676 = vmatprep.subr.bf16.mxu1 %v740_v1 }
 0x174   :  { %677 = vmatpush3.bf16.msra.mxu1 %v883_v23 }
 0x175   :  { %678 = vmatprep.subr.bf16.mxu1 %v740_v1 }
 0x178   :  { %679 = vmatpush3.bf16.msra.mxu1 %v894_v25 }
 0x179   :  { %680 = vmatprep.subr.bf16.mxu1 %v740_v1 }
 0x17c   :  { %681 = vmatpush3.bf16.msra.mxu1 %v715_v35 }
 0x17d   :  { %682 = vmatprep.subr.bf16.mxu1 %v740_v1 }
 0x180   :  { %683 = vmatpush3.bf16.msra.mxu1 %v717_v37 }
 0x183   :  { %685 = vmatmul.mubr.bf16.vlgmr.msra.gmra.mxu1 %v246_v60 }
 0x223   :  { %v361_v61 = vpop.f32.mrf.mxu1  ;;  %v449_v62 = vpop.f32.mrf.mxu0 }
 0x224   :  { %v450_v6 = vadd.f32 %v449_v62, %v361_v61 }
 0x225   :  { %v646_v63 = vpop.f32.mrf.mxu1  ;;  %v666_v0 = vpop.f32.mrf.mxu0 }
 0x227   :  { %v364_v2 = vpop.f32.mrf.mxu1  ;;  %v452_v3 = vpop.f32.mrf.mxu0 }
 0x229   :  { %v647_v4 = vpop.f32.mrf.mxu1  ;;  %v667_v5 = vpop.f32.mrf.mxu0 }
 0x243   :  { %v489_v7 = vpop.f32.mrf.mxu1 }
 0x244   :  { %v495_v9 = vadd.f32 %v489_v7, %v450_v6 }
 0x245   :  { %v686_v10 = vpop.f32.mrf.mxu1 }
 0x246   :  { %v496_v11 = vsub.f32 %v810_v8, %v495_v9 }
 0x247   :  { %v492_v12 = vpop.f32.mrf.mxu1 }
 0x248   :  { %498 = vrot.lane.b32.xlu1 %v496_v11, %s744_s3 }
 0x249   :  { %v687_v1 = vpop.f32.mrf.mxu1 }
 0x2ba   :  { %v499_v13 = vpop.permute.xlu1 %498 }
 0x2bb   :  { %v501_v14 = vsel %vm67_vm1, %v495_v9, %v499_v13 }
 0x2bc   :  { %502 = vst [vmem:[#allocation2] sm:$0xff] %v501_v14 }
 0x2bd   :  { %729 = shalt.err (!%p726_p4)
}
 0x2be   :  { %512 = dma.vmem_to_hbm [thread:$0]  %s510_s14, 128, %s941_s5, [#allocation3]  }
 0x2bf   :  { %738 = dma.done.wait [#allocation3], 128  }
 0x2c0   :  { %739 = vsyncadd [#allocation3], 4294967168 }
 0x2c1   :  { %516 = vsyncpa [#allocation3], 1 }

</bundles_post_ra>
